<compile_context>
chip_gen: v5e
topology: v5e:2x2
jax: 0.10.0
libtpu: 0.0.40
codegen_flags: <defaults>
</compile_context>

<pallas_src>
import jax
import jax.numpy as jnp
from jax import lax
from jax.experimental import pallas as pl
from jax.experimental.pallas import tpu as pltpu


def _round_up(x, m):
    return ((x + m - 1) // m) * m


def _vmem_capacity_bytes():
    """Physical VMEM per TensorCore (generation-aware), with a safe fallback."""
    try:
        info = pltpu.get_tpu_info()
        cap = getattr(info, "vmem_capacity_bytes", None)
        if cap:
            return int(cap)
    except Exception:
        pass
    return 64 << 20  # conservative: v7x per-TC VMEM (v5e/v6e have 128 MiB)


# ----------------------------------------------------------------------------
# Kernel A: direct row gather against a VMEM-resident table.
# ----------------------------------------------------------------------------
def _gather_vmem_table_kernel(ids_sref, table_ref, out_ref):
    # ids_sref : (N_pad,) int32 token ids, scalar-prefetched into SMEM.
    # table_ref: (Vp, E) embedding table, VMEM resident (constant index_map,
    #            fetched once across the whole grid).
    # out_ref  : (TB, E) lane/sublane-dense output block.
    tb = out_ref.shape[0]
    base = pl.program_id(0) * tb

    def row(r, carry):
        tok = ids_sref[base + r]                               # cheap SMEM scalar read
        out_ref[pl.ds(r, 1), :] = table_ref[pl.ds(tok, 1), :]  # exact row copy
        return carry

    lax.fori_loop(0, tb, row, 0)


# ----------------------------------------------------------------------------
# Kernel B: DMA gather from an HBM-resident table (large vocabularies).
# ----------------------------------------------------------------------------
def _gather_hbm_table_kernel(ids_sref, table_hbm, out_ref, stage_ref, dma_sems):
    # Table stays in HBM (memory_space=pl.ANY); per-row DMAs into a VMEM staging
    # buffer, double-buffered across two DMA semaphores so the next row's fetch
    # overlaps the wait on the current one.
    tb = out_ref.shape[0]
    base = pl.program_id(0) * tb

    def row_copy(r, slot):
        tok = ids_sref[base + r]
        return pltpu.make_async_copy(
            table_hbm.at[pl.ds(tok, 1), :],
            stage_ref.at[pl.ds(r, 1), :],
            dma_sems.at[slot])

    row_copy(0, 0).start()

    def body(r, carry):
        slot = lax.rem(r, 2)

        @pl.when(r + 1 < tb)
        def _():
            row_copy(r + 1, 1 - slot).start()

        row_copy(r, slot).wait()
        return carry

    lax.fori_loop(0, tb, body, 0)
    out_ref[...] = stage_ref[...]


# ----------------------------------------------------------------------------
# Host-side lookup wrapper.
# ----------------------------------------------------------------------------
def embedding_lookup(ids_flat, table, *, token_block=1024,
                     force_pallas=False, force_hbm_table=False):
    """Gather rows of `table` (V, E) at integer ids `ids_flat` (N,) -> (N, E)."""
    n = int(ids_flat.shape[0])
    v, e = table.shape
    itemsize = jnp.dtype(table.dtype).itemsize

    # Out-of-range / negative ids are clamped (PyTorch nn.Embedding would raise);
    # clamping guarantees the in-kernel dynamic slices / DMAs never read OOB VMEM/HBM.
    ids = jnp.clip(ids_flat.astype(jnp.int32), 0, v - 1)

    # Small-N escape hatch: a Pallas launch + table residency is pure overhead for
    # a few KiB of output; let XLA's fused gather handle it.
    if not force_pallas and n * e * itemsize < (256 << 10):
        return jnp.take(table, ids, axis=0)

    vmem_cap = _vmem_capacity_bytes()

    # Token chunk size: large blocks amortize the ~0.35us per-grid-step overhead,
    # but keep (2x out block + staging) within a fraction of VMEM and keep >= 2
    # chunks so the "parallel" grid axis can be split across v7x's 2 TensorCores.
    n8 = _round_up(max(n, 1), 8)
    tb = max(8, min(token_block, n8))
    max_tb = max(8, ((vmem_cap // 4) // max(1, 3 * e * itemsize)) // 8 * 8)
    tb = min(tb, max_tb)
    if n8 // tb < 2 and n8 >= 16:
        tb = _round_up((n8 + 1) // 2, 8)
    n_pad = _round_up(n8, tb)
    num_chunks = n_pad // tb

    # Pad ids with 0 (a valid row); padded rows are sliced off below.
    # TODO(synk): for very large N (>~100K tokens) chunk at the wrapper level so the
    # scalar-prefetched id vector stays comfortably inside SMEM.
    ids_pad = jnp.pad(ids, (0, n_pad - n))

    # Sublane-pad the vocab axis so a (Vp, E) block is dense for the VMEM path.
    v_pad = _round_up(v, 8)

    table_bytes = v_pad * e * itemsize
    out_block_bytes = tb * e * itemsize
    # Default BlockSpec pipelining double-buffers blocks -> budget 2x table + 2x out.
    # TODO(synk): pipeline_mode=pl.Buffered(1) on the constant-index table block would
    # halve the table footprint (most valuable on v7x's 64 MiB VMEM).
    vmem_need = 2 * table_bytes + 2 * out_block_bytes + (2 << 20)
    use_vmem_table = (not force_hbm_table) and vmem_need <= int(0.85 * vmem_cap)

    compiler_kwargs = dict(dimension_semantics=("parallel",))
    if use_vmem_table:
        kernel = _gather_vmem_table_kernel
        table_arg = table if v_pad == v else jnp.pad(table, ((0, v_pad - v), (0, 0)))
        table_spec = pl.BlockSpec((v_pad, e), lambda i, ids_sref: (0, 0))
        scratch_shapes = []
        if vmem_need > (16 << 20):  # above the most conservative scoped default (v5e)
            compiler_kwargs["vmem_limit_bytes"] = int(
                min(vmem_need + (4 << 20), int(0.9 * vmem_cap)))
    else:
        # HBM-resident table: per-row DMA gather (works for arbitrarily large vocab).
        kernel = _gather_hbm_table_kernel
        table_arg = table
        table_spec = pl.BlockSpec(memory_space=pl.ANY)
        scratch_shapes = [pltpu.VMEM((tb, e), table.dtype),
                          pltpu.SemaphoreType.DMA((2,))]

    out = pl.pallas_call(
        kernel,
        out_shape=jax.ShapeDtypeStruct((n_pad, e), table.dtype),
        grid_spec=pltpu.PrefetchScalarGridSpec(
            num_scalar_prefetch=1,
            grid=(num_chunks,),
            in_specs=[table_spec],
            out_specs=pl.BlockSpec((tb, e), lambda i, ids_sref: (i, 0)),
            scratch_shapes=scratch_shapes),
        compiler_params=pltpu.CompilerParams(**compiler_kwargs),
    )(ids_pad, table_arg)
    return out[:n]


# ----------------------------------------------------------------------------
# Forward pass (word branch, 2-D input), mirroring the PyTorch module.
# ----------------------------------------------------------------------------
def embedding_forward(input_var, w_embedding_table):
    """Returns (embedded, share_enc_embedded, mask, word_mask, sent_mask)."""
    b, t = input_var.shape
    e = w_embedding_table.shape[1]

    # mask = input_var.ne(0).byte() -- trivial elementwise op, left to XLA.
    mask = (input_var != 0).astype(jnp.uint8)
    word_mask, sent_mask = None, None

    # 2-D input: temp == input_var and dropout(p=0) is identity, so `embedded` and
    # `share_enc_embedded` are the same lookup -> do it once and reuse.
    embedded = embedding_lookup(input_var.reshape(-1), w_embedding_table)
    embedded = embedded.reshape(b, t, e)
    share_enc_embedded = embedded

    return embedded, share_enc_embedded, mask, word_mask, sent_mask


if __name__ == "__main__":
    # Small, module-consistent shapes.
    W_VOCAB = 64        # w_vocab_size
    C_VOCAB = 32        # c_vocab_size (unused in the 'word' forward path)
    W_EMB = 128         # w_embedding_size (lane-aligned)
    C_EMB = 16          # c_embedding_size (unused in the 'word' forward path)
    B, T = 2, 8

    key = jax.random.PRNGKey(0)
    k_w, k_c, k_ids, k_big = jax.random.split(key, 4)

    # nn.Embedding default init ~ N(0, 1). Direct row gather is exact, so no
    # dtype-rounding tricks are needed anymore.
    w_embedding_table = jax.random.normal(k_w, (W_VOCAB, W_EMB), dtype=jnp.float32)
    c_embedding_table = jax.random.normal(k_c, (C_VOCAB, C_EMB), dtype=jnp.float32)  # unused ('word')

    # Token ids with some zeros acting as padding.
    input_var = jax.random.randint(k_ids, (B, T), 0, W_VOCAB, dtype=jnp.int32)
    input_var = input_var.at[0, T - 2:].set(0).at[1, T - 3:].set(0)

    embedded, share_enc_embedded, mask, word_mask, sent_mask = embedding_forward(
        input_var, w_embedding_table)
    jax.block_until_ready((embedded, share_enc_embedded, mask))

    ref = jnp.take(w_embedding_table, input_var, axis=0)
    ref_mask = (input_var != 0).astype(jnp.uint8)
    assert embedded.shape == (B, T, W_EMB)
    assert share_enc_embedded.shape == (B, T, W_EMB)
    assert mask.shape == (B, T) and mask.dtype == jnp.uint8
    assert word_mask is None and sent_mask is None
    assert jnp.array_equal(embedded, ref)
    assert jnp.array_equal(share_enc_embedded, ref)
    assert jnp.array_equal(mask, ref_mask)

    # Exercise both Pallas gather kernels directly (the tiny forward above takes the
    # small-N escape hatch). Direct gathers are bit-exact, so compare with equality.
    BIG_V, BIG_N = 320, 1000
    big_ids = jax.random.randint(k_big, (BIG_N,), 0, BIG_V, dtype=jnp.int32)
    big_table = jax.random.normal(k_w, (BIG_V, W_EMB), dtype=jnp.float32)
    big_ref = jnp.take(big_table, big_ids, axis=0)

    out_vmem = embedding_lookup(big_ids, big_table, force_pallas=True)
    out_hbm = embedding_lookup(big_ids, big_table, force_pallas=True,
                               force_hbm_table=True)
    jax.block_until_ready((out_vmem, out_hbm))
    assert out_vmem.shape == (BIG_N, W_EMB)
    assert out_hbm.shape == (BIG_N, W_EMB)
    assert jnp.array_equal(out_vmem, big_ref)
    assert jnp.array_equal(out_hbm, big_ref)

    print("KERNEL_OK")
</pallas_src>

<mosaic_0001>
module attributes {stable_mosaic.version = 11 : i64} {
  func.func @_gather_vmem_table_kernel(%arg0: i32, %arg1: memref<1008xi32, #tpu.memory_space<smem>>, %arg2: memref<320x128xf32, #tpu.memory_space<vmem>>, %arg3: memref<504x128xf32, #tpu.memory_space<vmem>>) attributes {dimension_semantics = [#tpu.dimension_semantics<parallel>], iteration_bounds = array<i64: 2>, scalar_prefetch = 1 : i64, scratch_operands = 0 : i64, tpu.core_type = #tpu.core_type<tc>, window_params = [{pipeline_mode = #tpu.pipeline_mode<synchronous>, transform_indices = @transform_0, window_bounds = array<i64: 320, 128>}, {transform_indices = @transform_1, window_bounds = array<i64: 504, 128>}]} {
    %c504_i32 = arith.constant 504 : i32
    %0 = arith.muli %arg0, %c504_i32 : i32
    %c0_i32 = arith.constant 0 : i32
    %c504_i32_0 = arith.constant 504 : i32
    %1 = arith.addi %c0_i32, %c504_i32_0 : i32
    %c1_i32 = arith.constant 1 : i32
    scf.for %arg4 = %c0_i32 to %1 step %c1_i32  : i32 {
      %2 = arith.addi %0, %arg4 : i32
      %3 = arith.index_cast %2 : i32 to index
      %4 = memref.load %arg1[%3] : memref<1008xi32, #tpu.memory_space<smem>>
      %5 = arith.index_cast %4 : i32 to index
      %c0 = arith.constant 0 : index
      %6 = vector.load %arg2[%5, %c0] : memref<320x128xf32, #tpu.memory_space<vmem>>, vector<1x128xf32>
      %7 = arith.index_cast %arg4 : i32 to index
      %c0_2 = arith.constant 0 : index
      %8 = vector.load %arg3[%7, %c0_2] : memref<504x128xf32, #tpu.memory_space<vmem>>, vector<1x128xf32>
      tpu.vector_store %arg3[%7, %c0_2], %6 {strides = array<i32>} : memref<504x128xf32, #tpu.memory_space<vmem>>, vector<1x128xf32>,
    }
    %c504_i32_1 = arith.constant 504 : i32
    return
  }
  func.func @transform_0(%arg0: i32, %arg1: memref<1008xi32, #tpu.memory_space<smem>>) -> (i32, i32) {
    %c0_i32 = arith.constant 0 : i32
    %c0_i32_0 = arith.constant 0 : i32
    %c0_i32_1 = arith.constant 0 : i32
    return %c0_i32, %c0_i32_0 : i32, i32
  }
  func.func @transform_1(%arg0: i32, %arg1: memref<1008xi32, #tpu.memory_space<smem>>) -> (i32, i32) {
    %c0_i32 = arith.constant 0 : i32
    %c0_i32_0 = arith.constant 0 : i32
    return %arg0, %c0_i32 : i32, i32
  }
}

</mosaic_0001>

<bundles_post_ra>
// kernel: tpu_custom_call.1
= control target key start
LH: loop header
LB: loop body
LE: loop exit
PB: predicated region body
PF: predicated region fallthrough
CT: control target
= control target key end

     0   :  { %s413_s12 = smov [#allocation3]   ;;  %s527_s0 = inlined_call_operand.hbm [shape: s32[1008], index: 0, kind: input, shape index: {}]   ;;  %s528_s1 = inlined_call_operand.hbm [shape: f32[320,128], index: 1, kind: input, shape index: {}]   ;;  %s529_s2 = inlined_call_operand.hbm [shape: f32[1008,128], index: 2, kind: output, shape index: {}]  }
   0x1   :  { %s8_s11 = sshll.u32 %s527_s0, 4  ;;  %s9_s11 = int_to_ptr.hbm [resolvable:$true] %s8_s11 }
   0x2   :  { %11 = dma.hbm_to_smem %s9_s11, 128, %s413_s12, [#allocation2] }
   0x3   :  { %383 = dma.done.wait [#allocation2], 128 }
   0x4   :  { %384 = vsyncadd [#allocation2], 4294967168 }
   0x5   :  { %14 = sfence }
   0x6   :  { %15 = vsyncpa [#allocation5], 0 }
   0x7   :  { %16 = vsyncpa [#allocation6], 0 }
   0x8   :  { %18 = vsyncpa [#allocation6 + $0x1], 0  ;;  %s437_s13 = smov 0   ;;  %s439_s14 = smov 0  }
   0x9   :  { %s441_s15 = smov 0   ;;  %s443_s16 = smov 0  }
   0xa LB: > { %s458_s0 = sadd.s32 4294967295, %s407_s16   ;;  %s220_s17 = sadd.s32 4294967294, %s407_s16   ;;  %s407_s16 = sphi %s443_s16, %s535_s16   ;;  %s403_s15 = sphi %s441_s15, %s534_s15   ;;  %s399_s14 = sphi %s439_s14, %s533_s14   ;;  %s395_s13 = sphi %s437_s13, %s532_s13  }
   0xb   : > { %s462_s18 = sadd.s32 1, %s407_s16   ;;  %s52_s19 = sadd.s32 1, %s403_s15 }
   0xc   : > { %s49_s20 = ssub.s32 %s407_s16, %s462_s18  ;;  %p62_p0 = scmp.ne.s32.totalorder %s403_s15, %s399_s14 }
   0xd   : > { %p50_p1 = scmp.eq.s32.totalorder %s49_s20, 0  ;;  %p63_p2 = scmp.eq.s32.totalorder %s458_s0, 1 }
   0xe   : > { %p68_p3 = scmp.ne.s32.totalorder %s399_s14, %s395_s13  ;;  %p69_p4 = scmp.eq.s32.totalorder %s220_s17, 1 }
   0xf   : > { %s473_s21 = scalar_select %p50_p1, %s403_s15, %s52_s19  }
  0x10   : > { %p475_p5 = por %p63_p2, %p62_p0  ;;  %p479_p6 = por %p69_p4, %p68_p3 }
  0x11   : > { %p221_p7 = scmp.ge.s32.totalorder %s407_s16, 1  ;;  %p76_p8 = scmp.lt.s32.totalorder %s407_s16, 3 }
  0x12   : > { %p244_p9 = scmp.eq.s32.totalorder %s458_s0, 0  ;;  %s87_s26 = sshll.u32 %s528_s1, 4  ;;  %s88_s26 = int_to_ptr.hbm [resolvable:$true] %s87_s26 }
  0x13   : > { %p77_p10 = pnand %p221_p7, %p76_p8  ;;  %s414_s27 = smov [#allocation4]  }
  0x14   : > { %s89_s28 = sshll.u32 %s414_s27, 4  ;;  %s415_s29 = smov 128   ;;  %s90_s28 = int_to_ptr.vmem [resolvable:$true] %s89_s28 }
  0x15   : > { %p236_p11 = pneg %p77_p10  ;;  %s416_s30 = smov 8  }
  0x16   : > { %105 = sbr.rel (%p77_p10) target bundleno = 50 (0x32), region = 24 }
  0x17   : > { %p237_p12 = pnand %p244_p9, %p236_p11 }
  0x19   : > { %239 = dma.hbm_to_vmem [thread:$0]  (!%p237_p12), %s88_s26, 5120, %s90_s28, [#allocation5], %s415_s29, %s415_s29, %s416_s30  }
  0x1b   : > { %386 = dma.done.wait (%p244_p9), [#allocation5], 5120  }
  0x1c   : > { %388 = vsyncadd (%p244_p9), [#allocation5], 4294962176  ;;  %s118_s3 = sand.u32 1, %s399_s14   ;;  %s122_s4 = smul.u32 504, %s458_s0 }
  0x1d   : > { %s229_s5 = smul.u32 504, %s118_s3  ;;  %s409_s7 = smov 0  }
  0x1f   : > { %s120_s6 = scalar_lea.vmem [#allocation7], %s229_s5 }
  0x20 LB: >> { %s129_s8 = sadd.s32 %s411_s7, %s122_s4  ;;  %s133_s10 = scalar_lea.vmem %s120_s6, %s411_s7 [#allocation7]  ;;  %s411_s7 = sphi %s409_s7, %s128_s7  }
  0x21   : >> { %s130_s9 = sld [smem:[#allocation3 + %s129_s8]]  ;;  %s128_s7 = sadd.s32 1, %s411_s7  }
  0x22   : >> { %p125_p13 = scmp.ge.s32.totalorder %s128_s7, 504  }
  0x23   : > { %s147_s0 = scalar_lea.hbm (%p125_p13), %s529_s2, %s122_s4  ;;  %s148_s19 = sshll.u32 (%p125_p13), %s120_s6, 4  ;;  %s149_s19 = int_to_ptr.vmem [resolvable:$true] %s148_s19 }
  0x24   : > { %s150_s20 = sshll.u32 (%p125_p13), %s147_s0, 4  ;;  %s136_s24 = scalar_lea.sflag (%p125_p13), [#allocation6], %s118_s3  ;;  %s151_s20 = int_to_ptr.hbm [resolvable:$true] %s150_s20 }
  0x25   : > { %127 = sbr.rel (!%p125_p13) target bundleno = 32 (0x20), region = 70  ;;  %s349_s25 = sshra.s32 (%p125_p13), %s151_s20, 4  ;;  %s350_s25 = int_to_ptr.hbm [resolvable:$true] %s349_s25 }
  0x26   : > { %s351_s26 = scalar_lea.hbm (%p125_p13), %s350_s25, 504  ;;  %s355_s29 = scalar_lea.hbm (%p125_p13), %s529_s2, 1008 }
  0x27   : >> { %s131_s11 = scalar_lea.vmem [#allocation4], %s130_s9  ;;  %p352_p0 = scmp.ne.s32.totalorder (%p125_p13), %s350_s25, %s351_s26 }
  0x28   : >> { %v132_v0 = vld [vmem:[%s131_s11] sm:$0x1]  ;;  %p356_p3 = scmp.lt.s32.totalorder (%p125_p13), %s350_s25, %s529_s2  ;;  %p357_p4 = scmp.lt.s32.totalorder (%p125_p13), %s355_s29, %s351_s26 }
  0x29   : >> { %134 = vst [vmem:[%s133_s10] sm:$0x1] %v132_v0  ;;  %p353_p1 = pnand (%p125_p13), %p352_p0, %p475_p5 }
  0x2a   : > { %p358_p7 = por %p357_p4, %p356_p3 }
  0x2b   : > { %p354_p2 = pneg %p353_p1 }
  0x2d   : > { %p359_p8 = pnand %p358_p7, %p354_p2 }
  0x2f   : > { %362 = shalt.err (!%p359_p8)
}
  0x30   : > { %s417_s3 = smov 128   ;;  %s418_s4 = smov 8  }
  0x31   : > { %234 = dma.vmem_to_hbm [thread:$0]  (%p475_p5), %s149_s19, 8064, %s151_s20, %s136_s24, %s417_s3, %s417_s3, %s418_s4  }
  0x32 PF: > { %p246_p9 = scmp.ge.s32.totalorder %s407_s16, 2  ;;  %s165_s6 = sand.u32 1, %s395_s13  }
  0x33   : > { %s166_s7 = scalar_lea.sflag [#allocation6], %s165_s6 }
  0x34   : > { %p241_p10 = pnand %p246_p9, %p479_p6 }
  0x36   : > { %p242_p11 = pneg %p241_p10 }
  0x38   : > { %390 = dma.done.wait (%p242_p11), %s166_s7, 8064  }
  0x39   : > { %392 = vsyncadd (%p242_p11), %s166_s7, 4294959232  ;;  %p21_p12 = scmp.ge.s32.totalorder %s462_s18, 4   ;;  %s532_s13 = smov %s399_s14 }
  0x3a   : > { %s533_s14 = smov %s403_s15  ;;  %s534_s15 = smov %s473_s21 }
  0x3b   : > { %s535_s16 = smov %s462_s18  ;;  %23 = sbr.rel (!%p21_p12) target bundleno = 10 (0xa), region = 81 }
  0x40   :  { %172 = vsyncpa [#allocation5], 1 }
  0x41   :  { %174 = vsyncpa [#allocation5 + $0x1], 1 }
  0x42   :  { %175 = vsyncpa [#allocation6], 1 }
  0x43   :  { %177 = vsyncpa [#allocation6 + $0x1], 1 }

</bundles_post_ra>
